<compile_context>
chip_gen: v7x
topology: tpu7x:2x2x1
jax: 0.10.0
libtpu: 0.0.40
codegen_flags: <defaults>
</compile_context>

<pallas_src>
import jax
import jax.numpy as jnp
from jax.experimental import pallas as pl
from jax.experimental.pallas import tpu as pltpu

EPS = 1e-5  # nn.LayerNorm default eps


def _round_up(x, m):
    return ((x + m - 1) // m) * m


def _layernorm(h, gamma, beta):
    # f32 LayerNorm: biased variance, eps inside rsqrt (matches nn.LayerNorm).
    mu = jnp.mean(h, axis=-1, keepdims=True)
    var = jnp.mean((h - mu) * (h - mu), axis=-1, keepdims=True)
    return (h - mu) * jax.lax.rsqrt(var + EPS) * gamma + beta


def critic_kernel(state_ref, action_ref,
                  w1_ref, b1_ref, g1_ref, be1_ref,
                  w2s_ref, w2a_ref, b2_ref, g2_ref, be2_ref,
                  w3_ref, b3_ref,
                  out_ref):
    # fc1 (bf16 operands, f32 accumulate) -> ln1 -> relu
    h1 = jnp.dot(state_ref[...], w1_ref[...],
                 preferred_element_type=jnp.float32) + b1_ref[...]
    h1 = jnp.maximum(_layernorm(h1, g1_ref[...], be1_ref[...]), 0.0)

    # fc2 on concat([h1, action]) == h1 @ W2_s + action @ W2_a   (no explicit concat)
    h2 = (jnp.dot(h1.astype(jnp.bfloat16), w2s_ref[...],
                  preferred_element_type=jnp.float32)
          + jnp.dot(action_ref[...], w2a_ref[...],
                    preferred_element_type=jnp.float32)
          + b2_ref[...])
    h2 = jnp.maximum(_layernorm(h2, g2_ref[...], be2_ref[...]), 0.0)

    # fc3: single output column -> VPU multiply + lane reduction (skip the MXU entirely).
    out_ref[...] = jnp.sum(h2 * w3_ref[...], axis=-1, keepdims=True) + b3_ref[...]


def critic_forward(state, action, params, *, block_rows=256):
    B, state_dim = state.shape
    action_dim = action.shape[1]
    h1 = params["w1"].shape[1]
    h2 = params["w2s"].shape[1]

    # Batch tile: multiple of 8 sublanes, capped so even huge B fits comfortably in VMEM.
    TB = min(block_rows, _round_up(B, 8))
    grid = (pl.cdiv(B, TB),)

    # bf16 inputs for the MXU + halved I/O DMA bytes.
    state_bf = state.astype(jnp.bfloat16)
    action_bf = action.astype(jnp.bfloat16)

    def resident(shape):
        # Constant index map -> same block every step -> stays resident in VMEM.
        return pl.BlockSpec(shape, lambda i: (0, 0))

    in_specs = [
        pl.BlockSpec((TB, state_dim), lambda i: (i, 0)),
        pl.BlockSpec((TB, action_dim), lambda i: (i, 0)),
        resident(params["w1"].shape),
        resident(params["b1"].shape),
        resident(params["g1"].shape),
        resident(params["be1"].shape),
        resident(params["w2s"].shape),
        resident(params["w2a"].shape),
        resident(params["b2"].shape),
        resident(params["g2"].shape),
        resident(params["be2"].shape),
        resident(params["w3"].shape),
        resident(params["b3"].shape),
    ]
    out_spec = pl.BlockSpec((TB, 1), lambda i: (i, 0))

    param_bytes = sum(int(p.size) * p.dtype.itemsize for p in params.values())
    flops = 2 * B * (state_dim * h1 + (h1 + action_dim) * h2 + h2)
    bytes_accessed = (param_bytes
                      + B * (state_dim + action_dim) * 2   # bf16 inputs
                      + B * 4)                             # f32 output
    cost = pl.CostEstimate(flops=flops, transcendentals=2 * B,
                           bytes_accessed=bytes_accessed)

    return pl.pallas_call(
        critic_kernel,
        out_shape=jax.ShapeDtypeStruct((B, 1), jnp.float32),
        grid=grid,
        in_specs=in_specs,
        out_specs=out_spec,
        compiler_params=pltpu.CompilerParams(
            dimension_semantics=("parallel",)),     # megacore sharding on v7x
        cost_estimate=cost,
    )(state_bf, action_bf,
      params["w1"], params["b1"], params["g1"], params["be1"],
      params["w2s"], params["w2a"], params["b2"], params["g2"], params["be2"],
      params["w3"], params["b3"])


def init_params(key, state_dim, action_dim, hidden_dims):
    h1, h2 = hidden_dims
    ks = jax.random.split(key, 4)

    def xavier(k, fan_in, fan_out):
        bound = jnp.sqrt(6.0 / (fan_in + fan_out))
        # stored as (in, out) so the kernel does x @ W
        return jax.random.uniform(k, (fan_in, fan_out), jnp.float32, -bound, bound)

    w1 = xavier(ks[0], state_dim, h1)
    w2 = xavier(ks[1], h1 + action_dim, h2)       # PyTorch fc2 takes the concat input
    w3 = jax.random.uniform(ks[2], (h2, 1), jnp.float32, -0.003, 0.003)
    b3 = jax.random.uniform(ks[3], (1, 1), jnp.float32, -0.003, 0.003)

    return dict(
        # MXU operands in bf16; everything added/multiplied on the f32 path stays f32.
        w1=w1.astype(jnp.bfloat16),
        b1=jnp.zeros((1, h1), jnp.float32),
        g1=jnp.ones((1, h1), jnp.float32), be1=jnp.zeros((1, h1), jnp.float32),
        w2s=w2[:h1, :].astype(jnp.bfloat16),
        w2a=w2[h1:, :].astype(jnp.bfloat16),
        b2=jnp.zeros((1, h2), jnp.float32),
        g2=jnp.ones((1, h2), jnp.float32), be2=jnp.zeros((1, h2), jnp.float32),
        w3=w3.reshape(1, h2),                      # row form for the VPU reduction
        b3=b3,
    )


def critic_reference(state, action, p):
    """Pure-JAX reference mirroring the PyTorch forward (same bf16 matmul operands)."""
    h1 = jnp.dot(state.astype(jnp.bfloat16), p["w1"],
                 preferred_element_type=jnp.float32) + p["b1"]
    h1 = jnp.maximum(_layernorm(h1, p["g1"], p["be1"]), 0.0)
    h2 = (jnp.dot(h1.astype(jnp.bfloat16), p["w2s"],
                  preferred_element_type=jnp.float32)
          + jnp.dot(action.astype(jnp.bfloat16), p["w2a"],
                    preferred_element_type=jnp.float32)
          + p["b2"])
    h2 = jnp.maximum(_layernorm(h2, p["g2"], p["be2"]), 0.0)
    return jnp.sum(h2 * p["w3"], axis=-1, keepdims=True) + p["b3"]


if __name__ == "__main__":
    state_dim, action_dim = 16, 8
    hidden_dims = [400, 300]   # module defaults
    batch = 2

    key = jax.random.PRNGKey(0)
    k_params, k_state, k_action, k_state2, k_action2 = jax.random.split(key, 5)

    params = init_params(k_params, state_dim, action_dim, hidden_dims)

    # Small demo batch (single grid step).
    state = jax.random.normal(k_state, (batch, state_dim), jnp.float32)
    action = jax.random.normal(k_action, (batch, action_dim), jnp.float32)
    q = jax.block_until_ready(critic_forward(state, action, params))
    q_ref = critic_reference(state, action, params)
    assert q.shape == (batch, 1)
    assert jnp.allclose(q, q_ref, atol=2e-3, rtol=2e-3), (q, q_ref)

    # Larger batch exercising multiple pipelined grid steps + a partial last block.
    B2 = 20
    state2 = jax.random.normal(k_state2, (B2, state_dim), jnp.float32)
    action2 = jax.random.normal(k_action2, (B2, action_dim), jnp.float32)
    q2 = jax.block_until_ready(critic_forward(state2, action2, params, block_rows=8))
    q2_ref = critic_reference(state2, action2, params)
    assert q2.shape == (B2, 1)
    assert jnp.allclose(q2, q2_ref, atol=2e-3, rtol=2e-3), (q2, q2_ref)

    print("KERNEL_OK")
</pallas_src>

<mosaic_0001>
module attributes {stable_mosaic.version = 11 : i64} {
  func.func @critic_kernel(%arg0: i32, %arg1: memref<8x16xbf16, #tpu.memory_space<vmem>>, %arg2: memref<8x8xbf16, #tpu.memory_space<vmem>>, %arg3: memref<16x400xbf16, #tpu.memory_space<vmem>>, %arg4: memref<1x400xf32, #tpu.memory_space<vmem>>, %arg5: memref<1x400xf32, #tpu.memory_space<vmem>>, %arg6: memref<1x400xf32, #tpu.memory_space<vmem>>, %arg7: memref<400x300xbf16, #tpu.memory_space<vmem>>, %arg8: memref<8x300xbf16, #tpu.memory_space<vmem>>, %arg9: memref<1x300xf32, #tpu.memory_space<vmem>>, %arg10: memref<1x300xf32, #tpu.memory_space<vmem>>, %arg11: memref<1x300xf32, #tpu.memory_space<vmem>>, %arg12: memref<1x300xf32, #tpu.memory_space<vmem>>, %arg13: memref<1x1xf32, #tpu.memory_space<vmem>>, %arg14: memref<8x1xf32, #tpu.memory_space<vmem>>) attributes {dimension_semantics = [#tpu.dimension_semantics<parallel>], iteration_bounds = array<i64: 1>, scalar_prefetch = 0 : i64, scratch_operands = 0 : i64, tpu.core_type = #tpu.core_type<tc>, window_params = [{transform_indices = @transform_0, window_bounds = array<i64: 8, 16>}, {transform_indices = @transform_1, window_bounds = array<i64: 8, 8>}, {pipeline_mode = #tpu.pipeline_mode<synchronous>, transform_indices = @transform_2, window_bounds = array<i64: 16, 400>}, {pipeline_mode = #tpu.pipeline_mode<synchronous>, transform_indices = @transform_3, window_bounds = array<i64: 1, 400>}, {pipeline_mode = #tpu.pipeline_mode<synchronous>, transform_indices = @transform_4, window_bounds = array<i64: 1, 400>}, {pipeline_mode = #tpu.pipeline_mode<synchronous>, transform_indices = @transform_5, window_bounds = array<i64: 1, 400>}, {pipeline_mode = #tpu.pipeline_mode<synchronous>, transform_indices = @transform_6, window_bounds = array<i64: 400, 300>}, {pipeline_mode = #tpu.pipeline_mode<synchronous>, transform_indices = @transform_7, window_bounds = array<i64: 8, 300>}, {pipeline_mode = #tpu.pipeline_mode<synchronous>, transform_indices = @transform_8, window_bounds = array<i64: 1, 300>}, {pipeline_mode = #tpu.pipeline_mode<synchronous>, transform_indices = @transform_9, window_bounds = array<i64: 1, 300>}, {pipeline_mode = #tpu.pipeline_mode<synchronous>, transform_indices = @transform_10, window_bounds = array<i64: 1, 300>}, {pipeline_mode = #tpu.pipeline_mode<synchronous>, transform_indices = @transform_11, window_bounds = array<i64: 1, 300>}, {pipeline_mode = #tpu.pipeline_mode<synchronous>, transform_indices = @transform_12, window_bounds = array<i64: 1, 1>}, {transform_indices = @transform_13, window_bounds = array<i64: 8, 1>}]} {
    %c0 = arith.constant 0 : index
    %c0_0 = arith.constant 0 : index
    %0 = vector.load %arg1[%c0, %c0_0] : memref<8x16xbf16, #tpu.memory_space<vmem>>, vector<8x16xbf16>
    %c0_1 = arith.constant 0 : index
    %c0_2 = arith.constant 0 : index
    %1 = vector.load %arg3[%c0_1, %c0_2] : memref<16x400xbf16, #tpu.memory_space<vmem>>, vector<16x400xbf16>
    %cst = arith.constant dense<0.000000e+00> : vector<8x400xf32>
    %2 = tpu.matmul %0, %1, %cst {dimension_numbers = #tpu.dot_dimension_numbers<[1], [0], [0], [1], [0, 0, 1, 1], [], []>} : vector<8x16xbf16>, vector<16x400xbf16>, vector<8x400xf32> -> vector<8x400xf32>
    %c0_3 = arith.constant 0 : index
    %c0_4 = arith.constant 0 : index
    %3 = vector.load %arg4[%c0_3, %c0_4] : memref<1x400xf32, #tpu.memory_space<vmem>>, vector<1x400xf32>
    %4 = vector.broadcast %3 : vector<1x400xf32> to vector<8x400xf32>
    %5 = arith.addf %2, %4 : vector<8x400xf32>
    %c0_5 = arith.constant 0 : index
    %c0_6 = arith.constant 0 : index
    %6 = vector.load %arg5[%c0_5, %c0_6] : memref<1x400xf32, #tpu.memory_space<vmem>>, vector<1x400xf32>
    %c0_7 = arith.constant 0 : index
    %c0_8 = arith.constant 0 : index
    %7 = vector.load %arg6[%c0_7, %c0_8] : memref<1x400xf32, #tpu.memory_space<vmem>>, vector<1x400xf32>
    %cst_9 = arith.constant dense<0.000000e+00> : vector<8xf32>
    %8 = vector.multi_reduction <add>, %5, %cst_9 [1] : vector<8x400xf32> to vector<8xf32>
    %9 = vector.shape_cast %8 : vector<8xf32> to vector<8x1xf32>
    %cst_10 = arith.constant 4.000000e+02 : f32
    %10 = vector.broadcast %cst_10 : f32 to vector<8x1xf32>
    %11 = arith.divf %9, %10 : vector<8x1xf32>
    %12 = vector.broadcast %11 : vector<8x1xf32> to vector<8x400xf32>
    %13 = arith.subf %5, %12 : vector<8x400xf32>
    %14 = vector.broadcast %11 : vector<8x1xf32> to vector<8x400xf32>
    %15 = arith.subf %5, %14 : vector<8x400xf32>
    %16 = arith.mulf %13, %15 : vector<8x400xf32>
    %cst_11 = arith.constant dense<0.000000e+00> : vector<8xf32>
    %17 = vector.multi_reduction <add>, %16, %cst_11 [1] : vector<8x400xf32> to vector<8xf32>
    %18 = vector.shape_cast %17 : vector<8xf32> to vector<8x1xf32>
    %cst_12 = arith.constant 4.000000e+02 : f32
    %19 = vector.broadcast %cst_12 : f32 to vector<8x1xf32>
    %20 = arith.divf %18, %19 : vector<8x1xf32>
    %21 = vector.broadcast %11 : vector<8x1xf32> to vector<8x400xf32>
    %22 = arith.subf %5, %21 : vector<8x400xf32>
    %cst_13 = arith.constant 9.99999974E-6 : f32
    %23 = vector.broadcast %cst_13 : f32 to vector<8x1xf32>
    %24 = arith.addf %20, %23 : vector<8x1xf32>
    %25 = math.rsqrt %24 : vector<8x1xf32>
    %26 = vector.broadcast %25 : vector<8x1xf32> to vector<8x400xf32>
    %27 = arith.mulf %22, %26 : vector<8x400xf32>
    %28 = vector.broadcast %6 : vector<1x400xf32> to vector<8x400xf32>
    %29 = arith.mulf %27, %28 : vector<8x400xf32>
    %30 = vector.broadcast %7 : vector<1x400xf32> to vector<8x400xf32>
    %31 = arith.addf %29, %30 : vector<8x400xf32>
    %cst_14 = arith.constant 0.000000e+00 : f32
    %32 = vector.broadcast %cst_14 : f32 to vector<8x400xf32>
    %33 = arith.maximumf %31, %32 : vector<8x400xf32>
    %34 = arith.truncf %33 : vector<8x400xf32> to vector<8x400xbf16>
    %c0_15 = arith.constant 0 : index
    %c0_16 = arith.constant 0 : index
    %35 = vector.load %arg7[%c0_15, %c0_16] : memref<400x300xbf16, #tpu.memory_space<vmem>>, vector<400x300xbf16>
    %cst_17 = arith.constant dense<0.000000e+00> : vector<8x300xf32>
    %36 = tpu.matmul %34, %35, %cst_17 {dimension_numbers = #tpu.dot_dimension_numbers<[1], [0], [0], [1], [0, 0, 1, 1], [], []>} : vector<8x400xbf16>, vector<400x300xbf16>, vector<8x300xf32> -> vector<8x300xf32>
    %c0_18 = arith.constant 0 : index
    %c0_19 = arith.constant 0 : index
    %37 = vector.load %arg2[%c0_18, %c0_19] : memref<8x8xbf16, #tpu.memory_space<vmem>>, vector<8x8xbf16>
    %c0_20 = arith.constant 0 : index
    %c0_21 = arith.constant 0 : index
    %38 = vector.load %arg8[%c0_20, %c0_21] : memref<8x300xbf16, #tpu.memory_space<vmem>>, vector<8x300xbf16>
    %cst_22 = arith.constant dense<0.000000e+00> : vector<8x300xf32>
    %39 = tpu.matmul %37, %38, %cst_22 {dimension_numbers = #tpu.dot_dimension_numbers<[1], [0], [0], [1], [0, 0, 1, 1], [], []>} : vector<8x8xbf16>, vector<8x300xbf16>, vector<8x300xf32> -> vector<8x300xf32>
    %40 = arith.addf %36, %39 : vector<8x300xf32>
    %c0_23 = arith.constant 0 : index
    %c0_24 = arith.constant 0 : index
    %41 = vector.load %arg9[%c0_23, %c0_24] : memref<1x300xf32, #tpu.memory_space<vmem>>, vector<1x300xf32>
    %42 = vector.broadcast %41 : vector<1x300xf32> to vector<8x300xf32>
    %43 = arith.addf %40, %42 : vector<8x300xf32>
    %c0_25 = arith.constant 0 : index
    %c0_26 = arith.constant 0 : index
    %44 = vector.load %arg10[%c0_25, %c0_26] : memref<1x300xf32, #tpu.memory_space<vmem>>, vector<1x300xf32>
    %c0_27 = arith.constant 0 : index
    %c0_28 = arith.constant 0 : index
    %45 = vector.load %arg11[%c0_27, %c0_28] : memref<1x300xf32, #tpu.memory_space<vmem>>, vector<1x300xf32>
    %cst_29 = arith.constant dense<0.000000e+00> : vector<8xf32>
    %46 = vector.multi_reduction <add>, %43, %cst_29 [1] : vector<8x300xf32> to vector<8xf32>
    %47 = vector.shape_cast %46 : vector<8xf32> to vector<8x1xf32>
    %cst_30 = arith.constant 3.000000e+02 : f32
    %48 = vector.broadcast %cst_30 : f32 to vector<8x1xf32>
    %49 = arith.divf %47, %48 : vector<8x1xf32>
    %50 = vector.broadcast %49 : vector<8x1xf32> to vector<8x300xf32>
    %51 = arith.subf %43, %50 : vector<8x300xf32>
    %52 = vector.broadcast %49 : vector<8x1xf32> to vector<8x300xf32>
    %53 = arith.subf %43, %52 : vector<8x300xf32>
    %54 = arith.mulf %51, %53 : vector<8x300xf32>
    %cst_31 = arith.constant dense<0.000000e+00> : vector<8xf32>
    %55 = vector.multi_reduction <add>, %54, %cst_31 [1] : vector<8x300xf32> to vector<8xf32>
    %56 = vector.shape_cast %55 : vector<8xf32> to vector<8x1xf32>
    %cst_32 = arith.constant 3.000000e+02 : f32
    %57 = vector.broadcast %cst_32 : f32 to vector<8x1xf32>
    %58 = arith.divf %56, %57 : vector<8x1xf32>
    %59 = vector.broadcast %49 : vector<8x1xf32> to vector<8x300xf32>
    %60 = arith.subf %43, %59 : vector<8x300xf32>
    %cst_33 = arith.constant 9.99999974E-6 : f32
    %61 = vector.broadcast %cst_33 : f32 to vector<8x1xf32>
    %62 = arith.addf %58, %61 : vector<8x1xf32>
    %63 = math.rsqrt %62 : vector<8x1xf32>
    %64 = vector.broadcast %63 : vector<8x1xf32> to vector<8x300xf32>
    %65 = arith.mulf %60, %64 : vector<8x300xf32>
    %66 = vector.broadcast %44 : vector<1x300xf32> to vector<8x300xf32>
    %67 = arith.mulf %65, %66 : vector<8x300xf32>
    %68 = vector.broadcast %45 : vector<1x300xf32> to vector<8x300xf32>
    %69 = arith.addf %67, %68 : vector<8x300xf32>
    %cst_34 = arith.constant 0.000000e+00 : f32
    %70 = vector.broadcast %cst_34 : f32 to vector<8x300xf32>
    %71 = arith.maximumf %69, %70 : vector<8x300xf32>
    %c0_35 = arith.constant 0 : index
    %c0_36 = arith.constant 0 : index
    %72 = vector.load %arg12[%c0_35, %c0_36] : memref<1x300xf32, #tpu.memory_space<vmem>>, vector<1x300xf32>
    %73 = vector.broadcast %72 : vector<1x300xf32> to vector<8x300xf32>
    %74 = arith.mulf %71, %73 : vector<8x300xf32>
    %cst_37 = arith.constant dense<0.000000e+00> : vector<8xf32>
    %75 = vector.multi_reduction <add>, %74, %cst_37 [1] : vector<8x300xf32> to vector<8xf32>
    %76 = vector.shape_cast %75 : vector<8xf32> to vector<8x1xf32>
    %c0_38 = arith.constant 0 : index
    %c0_39 = arith.constant 0 : index
    %77 = vector.load %arg13[%c0_38, %c0_39] : memref<1x1xf32, #tpu.memory_space<vmem>>, vector<1x1xf32>
    %78 = vector.broadcast %77 : vector<1x1xf32> to vector<8x1xf32>
    %79 = arith.addf %76, %78 : vector<8x1xf32>
    %c0_40 = arith.constant 0 : index
    %c0_41 = arith.constant 0 : index
    %80 = vector.load %arg14[%c0_40, %c0_41] : memref<8x1xf32, #tpu.memory_space<vmem>>, vector<8x1xf32>
    tpu.vector_store %arg14[%c0_40, %c0_41], %79 {strides = array<i32>} : memref<8x1xf32, #tpu.memory_space<vmem>>, vector<8x1xf32>,
    return
  }
  func.func @transform_0(%arg0: i32) -> (i32, i32) {
    %c0_i32 = arith.constant 0 : i32
    %c0_i32_0 = arith.constant 0 : i32
    return %arg0, %c0_i32 : i32, i32
  }
  func.func @transform_1(%arg0: i32) -> (i32, i32) {
    %c0_i32 = arith.constant 0 : i32
    %c0_i32_0 = arith.constant 0 : i32
    return %arg0, %c0_i32 : i32, i32
  }
  func.func @transform_2(%arg0: i32) -> (i32, i32) {
    %c0_i32 = arith.constant 0 : i32
    %c0_i32_0 = arith.constant 0 : i32
    %c0_i32_1 = arith.constant 0 : i32
    return %c0_i32, %c0_i32_0 : i32, i32
  }
  func.func @transform_3(%arg0: i32) -> (i32, i32) {
    %c0_i32 = arith.constant 0 : i32
    %c0_i32_0 = arith.constant 0 : i32
    %c0_i32_1 = arith.constant 0 : i32
    return %c0_i32, %c0_i32_0 : i32, i32
  }
  func.func @transform_4(%arg0: i32) -> (i32, i32) {
    %c0_i32 = arith.constant 0 : i32
    %c0_i32_0 = arith.constant 0 : i32
    %c0_i32_1 = arith.constant 0 : i32
    return %c0_i32, %c0_i32_0 : i32, i32
  }
  func.func @transform_5(%arg0: i32) -> (i32, i32) {
    %c0_i32 = arith.constant 0 : i32
    %c0_i32_0 = arith.constant 0 : i32
    %c0_i32_1 = arith.constant 0 : i32
    return %c0_i32, %c0_i32_0 : i32, i32
  }
  func.func @transform_6(%arg0: i32) -> (i32, i32) {
    %c0_i32 = arith.constant 0 : i32
    %c0_i32_0 = arith.constant 0 : i32
    %c0_i32_1 = arith.constant 0 : i32
    return %c0_i32, %c0_i32_0 : i32, i32
  }
  func.func @transform_7(%arg0: i32) -> (i32, i32) {
    %c0_i32 = arith.constant 0 : i32
    %c0_i32_0 = arith.constant 0 : i32
    %c0_i32_1 = arith.constant 0 : i32
    return %c0_i32, %c0_i32_0 : i32, i32
  }
  func.func @transform_8(%arg0: i32) -> (i32, i32) {
    %c0_i32 = arith.constant 0 : i32
    %c0_i32_0 = arith.constant 0 : i32
    %c0_i32_1 = arith.constant 0 : i32
    return %c0_i32, %c0_i32_0 : i32, i32
  }
  func.func @transform_9(%arg0: i32) -> (i32, i32) {
    %c0_i32 = arith.constant 0 : i32
    %c0_i32_0 = arith.constant 0 : i32
    %c0_i32_1 = arith.constant 0 : i32
    return %c0_i32, %c0_i32_0 : i32, i32
  }
  func.func @transform_10(%arg0: i32) -> (i32, i32) {
    %c0_i32 = arith.constant 0 : i32
    %c0_i32_0 = arith.constant 0 : i32
    %c0_i32_1 = arith.constant 0 : i32
    return %c0_i32, %c0_i32_0 : i32, i32
  }
  func.func @transform_11(%arg0: i32) -> (i32, i32) {
    %c0_i32 = arith.constant 0 : i32
    %c0_i32_0 = arith.constant 0 : i32
    %c0_i32_1 = arith.constant 0 : i32
    return %c0_i32, %c0_i32_0 : i32, i32
  }
  func.func @transform_12(%arg0: i32) -> (i32, i32) {
    %c0_i32 = arith.constant 0 : i32
    %c0_i32_0 = arith.constant 0 : i32
    %c0_i32_1 = arith.constant 0 : i32
    return %c0_i32, %c0_i32_0 : i32, i32
  }
  func.func @transform_13(%arg0: i32) -> (i32, i32) {
    %c0_i32 = arith.constant 0 : i32
    %c0_i32_0 = arith.constant 0 : i32
    return %arg0, %c0_i32 : i32, i32
  }
}

</mosaic_0001>

<bundles_post_ra>
// kernel: tpu_custom_call.1
= control target key start
LH: loop header
LB: loop body
LE: loop exit
PB: predicated region body
PF: predicated region fallthrough
CT: control target
= control target key end

     0   :  { %s1990_s0 = inlined_call_operand.hbm [shape: bf16[2,16], index: 0, kind: input, shape index: {}]   ;;  %s1991_s1 = inlined_call_operand.hbm [shape: bf16[2,8], index: 1, kind: input, shape index: {}]   ;;  %s1992_s2 = inlined_call_operand.hbm [shape: bf16[16,400], index: 2, kind: input, shape index: {}]   ;;  %s1993_s3 = inlined_call_operand.vmem [shape: f32[1,400], index: 3, kind: input, shape index: {}]   ;;  %s1994_s4 = inlined_call_operand.vmem [shape: f32[1,400], index: 4, kind: input, shape index: {}]   ;;  %s1995_s5 = inlined_call_operand.hbm [shape: f32[1,400], index: 5, kind: input, shape index: {}]   ;;  %s1996_s6 = inlined_call_operand.hbm [shape: bf16[400,300], index: 6, kind: input, shape index: {}]   ;;  %s1997_s7 = inlined_call_operand.vmem [shape: bf16[8,300], index: 7, kind: input, shape index: {}]   ;;  %s1998_s8 = inlined_call_operand.vmem [shape: f32[1,300], index: 8, kind: input, shape index: {}]   ;;  %s1999_s9 = inlined_call_operand.vmem [shape: f32[1,300], index: 9, kind: input, shape index: {}]   ;;  %s2000_s10 = inlined_call_operand.vmem [shape: f32[1,300], index: 10, kind: input, shape index: {}]   ;;  %s2001_s11 = inlined_call_operand.vmem [shape: f32[1,300], index: 11, kind: input, shape index: {}]   ;;  %s2002_s12 = inlined_call_operand.<no memory space> [shape: f32[1,1], index: 12, kind: input, shape index: {}]   ;;  %s2003_s13 = inlined_call_operand.vmem [shape: f32[2,1], index: 13, kind: output, shape index: {}]  }
   0x1   :  { %v18_v0 = vstv %s2002_s12 }
   0x2   :  { %19 = vst [vmem:[#allocation2] sm:$0x1] %v18_v0 }
   0x3   :  { %20 = vsyncpa [#allocation4], 0 }
   0x4   :  { %21 = vsyncpa [#allocation6], 0 }
   0x5   :  { %22 = vsyncpa [#allocation9], 0 }
   0x6   :  { %27 = vsyncadd [#allocation4], 48  ;;  %s1696_s27 = smov [#allocation3]   ;;  %s1580_s14 = scalar_lea.hbm %s1990_s0, 16 }
   0x7   :  { %s28_s28 = sshll.u32 %s1696_s27, 4  ;;  %p1581_p0 = scmp.ne.s32.totalorder %s1990_s0, %s1580_s14  ;;  %s29_s28 = int_to_ptr.vmem [resolvable:$true] %s28_s28 }
   0x8   :  { %p1584_p1 = scmp.lt.u32.totalorder %s1580_s14, %s1990_s0 }
   0xa   :  { %p1586_p2 = pnand %p1584_p1, %p1581_p0 }
   0xc   :  { %1589 = shalt.err (!%p1586_p2)
}
   0xd   :  { %s1590_s12 = scalar_lea.vmem %s29_s28, 16  ;;  %s1594_s19 = scalar_lea.vmem %s29_s28, 64 }
   0xe   :  { %p1591_p3 = scmp.ne.s32.totalorder %s29_s28, %s1590_s12  ;;  %p1595_p4 = scmp.lt.s32.totalorder %s29_s28, %s29_s28 }
   0xf   :  { %p1596_p5 = scmp.lt.s32.totalorder %s1594_s19, %s1590_s12 }
  0x11   :  { %p1597_p6 = por %p1596_p5, %p1595_p4 }
  0x13   :  { %p1598_p7 = pnand %p1597_p6, %p1591_p3 }
  0x15   :  { %1601 = shalt.err (!%p1598_p7)
}
  0x16   :  { %s1697_s20 = smov 16   ;;  %s1698_s21 = smov 1  }
  0x17   :  { %34 = dma.hbm_to_vmem [thread:$0]  %s1990_s0, 16, %s29_s28, [#allocation4], %s1697_s20, %s1697_s20, %s1698_s21  }
  0x18   :  { %39 = vsyncadd [#allocation6], 48  ;;  %s1699_s24 = smov [#allocation5]   ;;  %s1700_s26 = smov [#allocation8]  }
  0x19   :  { %s40_s25 = sshll.u32 %s1699_s24, 4  ;;  %s69_s27 = sshll.u32 %s1700_s26, 4  ;;  %s41_s25 = int_to_ptr.vmem [resolvable:$true] %s40_s25  ;;  %s70_s27 = int_to_ptr.vmem [resolvable:$true] %s69_s27 }
  0x1a   :  { %s1602_s14 = scalar_lea.hbm %s1991_s1, 16 }
  0x1b   :  { %p1603_p8 = scmp.ne.s32.totalorder %s1991_s1, %s1602_s14  ;;  %p1606_p9 = scmp.lt.u32.totalorder %s1602_s14, %s1991_s1 }
  0x1d   :  { %p1608_p10 = pnand %p1606_p9, %p1603_p8 }
  0x1f   :  { %1611 = shalt.err (!%p1608_p10)
}
  0x20   :  { %s1612_s0 = scalar_lea.vmem %s41_s25, 16  ;;  %s1616_s28 = scalar_lea.vmem %s41_s25, 64 }
  0x21   :  { %p1613_p11 = scmp.ne.s32.totalorder %s41_s25, %s1612_s0  ;;  %p1617_p12 = scmp.lt.s32.totalorder %s41_s25, %s41_s25 }
  0x22   :  { %p1618_p13 = scmp.lt.s32.totalorder %s1616_s28, %s1612_s0 }
  0x24   :  { %p1619_p0 = por %p1618_p13, %p1617_p12 }
  0x26   :  { %p1620_p1 = pnand %p1619_p0, %p1613_p11 }
  0x28   :  { %1623 = shalt.err (!%p1620_p1)
}
  0x29   :  { %46 = dma.hbm_to_vmem [thread:$0]  %s1991_s1, 16, %s41_s25, [#allocation6], %s1697_s20, %s1697_s20, %s1698_s21  }
  0x2a   :  { %s1624_s24 = scalar_lea.hbm %s1995_s5, 64 }
  0x2b   :  { %p1625_p2 = scmp.ne.s32.totalorder %s1995_s5, %s1624_s24  ;;  %p1628_p3 = scmp.lt.u32.totalorder %s1624_s24, %s1995_s5 }
  0x2d   :  { %p1630_p4 = pnand %p1628_p3, %p1625_p2 }
  0x2f   :  { %1633 = shalt.err (!%p1630_p4)
}
  0x30   :  { %s1634_s15 = scalar_lea.vmem %s70_s27, 64  ;;  %p1639_p6 = scmp.lt.s32.totalorder %s70_s27, %s70_s27 }
  0x31   :  { %p1635_p5 = scmp.ne.s32.totalorder %s70_s27, %s1634_s15  ;;  %p1640_p7 = scmp.lt.s32.totalorder %s1634_s15, %s1634_s15 }
  0x33   :  { %p1641_p8 = por %p1640_p7, %p1639_p6 }
  0x35   :  { %p1642_p9 = pnand %p1641_p8, %p1635_p5 }
  0x37   :  { %1645 = shalt.err (!%p1642_p9)
}
  0x38   :  { %72 = dma.hbm_to_vmem [thread:$0]  %s1995_s5, 64, %s70_s27, [#allocation9]  }
  0x39   :  { %s1701_s25 = smov [#allocation7]   ;;  %s1702_s17 = smov [#allocation10]  }
  0x3a   :  { %s52_s16 = sshll.u32 %s1701_s25, 4  ;;  %s78_s18 = sshll.u32 %s1702_s17, 4  ;;  %s53_s16 = int_to_ptr.vmem [resolvable:$true] %s52_s16  ;;  %s79_s18 = int_to_ptr.vmem [resolvable:$true] %s78_s18 }
  0x3b   :  { %s1646_s12 = scalar_lea.hbm %s1992_s2, 512 }
  0x3c   :  { %p1647_p10 = scmp.ne.s32.totalorder %s1992_s2, %s1646_s12  ;;  %p1650_p11 = scmp.lt.u32.totalorder %s1646_s12, %s1992_s2 }
  0x3e   :  { %p1652_p12 = pnand %p1650_p11, %p1647_p10 }
  0x40   :  { %1655 = shalt.err (!%p1652_p12)
}
  0x41   :  { %s1656_s5 = scalar_lea.vmem %s53_s16, 512  ;;  %p1661_p0 = scmp.lt.s32.totalorder %s53_s16, %s53_s16 }
  0x42   :  { %p1657_p13 = scmp.ne.s32.totalorder %s53_s16, %s1656_s5  ;;  %p1662_p1 = scmp.lt.s32.totalorder %s1656_s5, %s1656_s5 }
  0x44   :  { %p1663_p2 = por %p1662_p1, %p1661_p0 }
  0x46   :  { %p1664_p3 = pnand %p1663_p2, %p1657_p13 }
  0x48   :  { %1667 = shalt.err (!%p1664_p3)
}
  0x49   :  { %s1703_s27 = smov 256   ;;  %s1668_s15 = scalar_lea.hbm %s1996_s6, 9600 }
  0x4a   :  { %58 = dma.hbm_to_vmem [thread:$0]  %s1992_s2, 512, %s53_s16, [#allocation6], %s1703_s27, %s1703_s27, %s1697_s20  }
  0x4b   :  { %p1669_p4 = scmp.ne.s32.totalorder %s1996_s6, %s1668_s15  ;;  %p1672_p5 = scmp.lt.u32.totalorder %s1668_s15, %s1996_s6 }
  0x4d   :  { %p1674_p6 = pnand %p1672_p5, %p1669_p4 }
  0x4f   :  { %1677 = shalt.err (!%p1674_p6)
}
  0x50   :  { %s1678_s0 = scalar_lea.vmem %s79_s18, 9600  ;;  %p1683_p8 = scmp.lt.s32.totalorder %s79_s18, %s79_s18 }
  0x51   :  { %p1679_p7 = scmp.ne.s32.totalorder %s79_s18, %s1678_s0  ;;  %p1684_p9 = scmp.lt.s32.totalorder %s1678_s0, %s1678_s0 }
  0x53   :  { %p1685_p10 = por %p1684_p9, %p1683_p8 }
  0x55   :  { %p1686_p11 = pnand %p1685_p10, %p1679_p7 }
  0x57   :  { %1689 = shalt.err (!%p1686_p11)
}
  0x58   :  { %s1704_s2 = smov 192   ;;  %s1705_s20 = smov 12  }
  0x59   :  { %84 = dma.hbm_to_vmem [thread:$0]  %s1996_s6, 9600, %s79_s18, [#allocation9], %s1704_s2, %s1704_s2, %s1705_s20  }
  0x5a   :  { %1690 = dma.done.wait [#allocation4], 64  }
  0x5b   :  { %1691 = vsyncadd [#allocation4], 4294967232 }
  0x5c   :  { %1692 = dma.done.wait [#allocation6], 576  }
  0x5d   :  { %1693 = vsyncadd [#allocation6], 4294966720 }
  0x5e   :  { %1694 = dma.done.wait [#allocation9], 9664  }
  0x5f   :  { %1695 = vsyncadd [#allocation9], 4294957632  ;;  %v1706_v1 = vmov 0   ;;  %v123_v2 = vlaneseq  ;;  %v1707_v3 = vmov 1966171168   ;;  %vm191_vm0 = vcmask 130048  }
  0x60   :  { %227 = vmatprep.mubr.bf16.mxu1 %v1706_v1  ;;  %v150_v4 = vunpack.c.l.s4 %v1707_v3  ;;  %v1467_v7 = vld [vmem:[#allocation7 + $0x4] ss:$16 sps:$4 sm:$0xff]   ;;  %v1469_v8 = vld [vmem:[#allocation7] ss:$16 sps:$4 sm:$0xff]   ;;  %v1472_v9 = vld [vmem:[#allocation7 + $0xc] ss:$16 sps:$4 sm:$0xff]  }
  0x61   :  { %v124_v5 = vshrl.u32 %v123_v2, 7  ;;  %195 = vmatprep.subr.bf16.mxu1 %v1467_v7  ;;  %v113_v10 = vld [vmem:[#allocation3] sm:$0x1]  ;;  %v114_v12 = vld [vmem:[#allocation3 + $0x1] sm:$0x1]  ;;  %vm512_vm1 = vcmask 1043456  }
  0x62   :  { %v151_v6 = vunpack.c.0.s8 %v150_v4  ;;  %196 = vmatpush1.bf16.msra.mxu1 %v1469_v8  ;;  %v115_v13 = vld [vmem:[#allocation3 + $0x2] sm:$0x1]  ;;  %v116_v14 = vld [vmem:[#allocation3 + $0x3] sm:$0x1]  ;;  %v147_v15 = vcombine.low %v113_v10, %v114_v12  ;;  %v1473_v47 = vld [vmem:[#allocation10 + $0x4] ss:$12 sps:$4 sm:$0xff]  }
  0x63   :  { %236 = vmatprep.subr.bf16.mxu1 %v1472_v9  ;;  %v148_v16 = vcombine.low %v115_v13, %v116_v14  ;;  %v1470_v19 = vld [vmem:[#allocation7 + $0x8] ss:$16 sps:$4 sm:$0xff]   ;;  %v1858_v22 = vsub.s32 0, %v124_v5  ;;  %v1860_v23 = vsub.s32 1, %v124_v5  ;;  %v1867_v29 = vsub.s32 2, %v124_v5  ;;  %1006 = vmatprep.subr.bf16.mxu0 %v1473_v47 }
  0x64   :  { %v1849_v11 = vsub.s32 %v151_v6, %v124_v5  ;;  %v121_v24 = vld [vmem:[%s1993_s3] sm:$0xf]  ;;  %v1869_v31 = vsub.s32 3, %v124_v5  ;;  %v1475_v48 = vld [vmem:[#allocation10] ss:$12 sps:$4 sm:$0xff]   ;;  %v1708_v2 = vmov 0.0  }
  0x65   :  { %v126_v26 = vrot.slane %v121_v24, %v1858_v22  ;;  %v130_v27 = vrot.slane %v121_v24, %v1860_v23  ;;  %v134_v35 = vrot.slane %v121_v24, %v1867_v29  ;;  %v1476_v49 = vld [vmem:[#allocation10 + $0x1c] ss:$12 sps:$4 sm:$0xff]   ;;  %v470_v50 = vld [vmem:[%s1997_s7] sm:$0xff]  ;;  %1007 = vmatpush1.bf16.msra.mxu0 %v1475_v48  ;;  %v469_v58 = vld [vmem:[#allocation5 + $0x3] sm:$0x1]  ;;  %vm508_vm2 = vcmask 64512  }
  0x66   :  { %v155_v17 = vrot.slane %v147_v15, %v1849_v11  ;;  %v162_v18 = vrot.slane %v148_v16, %v1849_v11  ;;  %v138_v36 = vrot.slane %v121_v24, %v1869_v31  ;;  %v1478_v51 = vld [vmem:[#allocation10 + $0x18] ss:$12 sps:$4 sm:$0xff]   ;;  %v1479_v52 = vld [vmem:[#allocation10 + $0x34] ss:$12 sps:$4 sm:$0xff]   ;;  %v1340_v53 = vcombine.high %v470_v50, %v470_v50  ;;  %1008 = vmatprep.subr.bf16.mxu0 %v1476_v49  ;;  %v1481_v62 = vld [vmem:[#allocation10 + $0x30] ss:$12 sps:$4 sm:$0xff]  }
  0x67   :  { %v1339_v54 = vcombine.low %v470_v50, %v470_v50  ;;  %v466_v55 = vld [vmem:[#allocation5] sm:$0x1]  ;;  %v467_v56 = vld [vmem:[#allocation5 + $0x1] sm:$0x1]  ;;  %v468_v57 = vld [vmem:[#allocation5 + $0x2] sm:$0x1] }
  0x68   :  { %v163_v20 = vcombine.low %v155_v17, %v162_v18  ;;  %v476_v60 = vcombine.low %v466_v55, %v467_v56  ;;  %v477_v61 = vcombine.low %v468_v57, %v469_v58  ;;  %v1492_v3 = vld [vmem:[%s1997_s7 + $0x8] ss:$0 sps:$4 sm:$0xff]   ;;  %v1486_v6 = vld [vmem:[#allocation10 + $0x48] ss:$12 sps:$4 sm:$0xff]   ;;  %v1501_v9 = vld [vmem:[#allocation10 + $0x184] ss:$12 sps:$4 sm:$0xff]  }
  0x69   :  { %v514_v59 = vsel %vm512_vm1, %v1339_v54, 0  ;;  %1009 = vmatpush1.bf16.msra.mxu0 %v1478_v51  ;;  %v1483_v4 = vld [vmem:[#allocation10 + $0x4c] ss:$12 sps:$4 sm:$0xff]   ;;  %v520_v8 = vsel %vm512_vm1, %v1492_v3, 0  ;;  %v1487_v10 = vld [vmem:[#allocation10 + $0x64] ss:$12 sps:$4 sm:$0xff]  }
  0x6a   :  { %v170_v21 = vrot.slane %v163_v20, %v1849_v11  ;;  %v484_v63 = vrot.slane %v476_v60, %v1849_v11  ;;  %v491_v0 = vrot.slane %v477_v61, %v1849_v11  ;;  %1010 = vmatprep.subr.bf16.mxu0 %v1479_v52  ;;  %vm1709_vm3 = vmmov 0   ;;  %v1489_v12 = vld [vmem:[#allocation10 + $0x60] ss:$12 sps:$4 sm:$0xff]   ;;  %v1490_v13 = vld [vmem:[#allocation10 + $0x7c] ss:$12 sps:$4 sm:$0xff]  }
  0x6b   :  { %v1499_v14 = vld [vmem:[#allocation10 + $0x180] ss:$12 sps:$4 sm:$0xff]   ;;  %v1493_v15 = vld [vmem:[#allocation10 + $0x78] ss:$12 sps:$4 sm:$0xff]   ;;  %v1507_v16 = vld [vmem:[#allocation10 + $0x19c] ss:$12 sps:$4 sm:$0xff]  }
  0x6c   :  { %1337 = vmatmul.mubr.msk.bf16.vlgmr.msra.gmra.mrb[0].mxu1 %vm191_vm0, %v170_v21  ;;  %v492_v5 = vcombine.low %v484_v63, %v491_v0  ;;  %v1505_v17 = vld [vmem:[#allocation10 + $0x198] ss:$12 sps:$4 sm:$0xff]   ;;  %v1496_v18 = vld [vmem:[#allocation10 + $0x90] ss:$12 sps:$4 sm:$0xff]   ;;  %v1502_v24 = vld [vmem:[#allocation10 + $0xa8] ss:$12 sps:$4 sm:$0xff]  }
  0x6d   :  { %237 = vmatpush1.bf16.msra.mxu1 %v1470_v19  ;;  %268 = vmatprep.mubr.bf16.mxu1 %v1706_v1  ;;  %v1513_v19 = vld [vmem:[#allocation10 + $0x1b4] ss:$12 sps:$4 sm:$0xff]   ;;  %v1497_v20 = vld [vmem:[#allocation10 + $0xac] ss:$12 sps:$4 sm:$0xff]   ;;  %v1520_v48 = vld [vmem:[#allocation10 + $0xf0] ss:$12 sps:$4 sm:$0xff]  }
  0x6e   :  { %1342 = vmatprep.subr.msk.bf16.mxu1 %vm512_vm1, %v1340_v53  ;;  %1011 = vmatpush1.bf16.msra.mxu0 %v1481_v62  ;;  %v499_v7 = vrot.slane %v492_v5, %v1849_v11  ;;  %v1494_v11 = vld [vmem:[#allocation10 + $0x94] ss:$12 sps:$4 sm:$0xff]   ;;  %v1521_v49 = vld [vmem:[#allocation10 + $0x10c] ss:$12 sps:$4 sm:$0xff]   ;;  %v1525_v50 = vld [vmem:[#allocation10 + $0x1e4] ss:$12 sps:$4 sm:$0xff]  }
  0x6f   :  { %1012 = vmatprep.subr.bf16.mxu0 %v1483_v4  ;;  %v1517_v47 = vld [vmem:[#allocation10 + $0x1c8] ss:$12 sps:$4 sm:$0xff]   ;;  %v1523_v51 = vld [vmem:[#allocation10 + $0x1e0] ss:$12 sps:$4 sm:$0xff]   ;;  %v1527_v53 = vld [vmem:[#allocation10 + $0x124] ss:$12 sps:$4 sm:$0xff]  }
  0x70   :  { %v1526_v52 = vld [vmem:[#allocation10 + $0x108] ss:$12 sps:$4 sm:$0xff]   ;;  %v1529_v55 = vld [vmem:[#allocation10 + $0x1f8] ss:$12 sps:$4 sm:$0xff]   ;;  %v1532_v56 = vld [vmem:[#allocation10 + $0x120] ss:$12 sps:$4 sm:$0xff]  }
  0x71   :  { %v1531_v54 = vld [vmem:[#allocation10 + $0x1fc] ss:$12 sps:$4 sm:$0xff]   ;;  %v1537_v58 = vld [vmem:[#allocation10 + $0x214] ss:$12 sps:$4 sm:$0xff]   ;;  %v1538_v60 = vld [vmem:[#allocation10 + $0x138] ss:$12 sps:$4 sm:$0xff]  }
  0x72   :  { %1013 = vmatpush1.bf16.msra.mxu0 %v1486_v6  ;;  %v1533_v57 = vld [vmem:[#allocation10 + $0x13c] ss:$12 sps:$4 sm:$0xff]   ;;  %v1539_v61 = vld [vmem:[#allocation10 + $0x154] ss:$12 sps:$4 sm:$0xff]   ;;  %v1543_v62 = vld [vmem:[#allocation10 + $0x22c] ss:$12 sps:$4 sm:$0xff]  }
  0x73   :  { %1014 = vmatprep.subr.bf16.mxu0 %v1487_v10  ;;  %v1541_v63 = vld [vmem:[#allocation10 + $0x228] ss:$12 sps:$4 sm:$0xff]   ;;  %v1544_v0 = vld [vmem:[#allocation10 + $0x150] ss:$12 sps:$4 sm:$0xff]   ;;  %v1547_v4 = vld [vmem:[#allocation10 + $0x240] ss:$12 sps:$4 sm:$0xff]  }
  0x74   :  { %1338 = vmatmul.mubr.msk.bf16.vlgmr.msra.gmra.mrb[4].mxu1 %vm191_vm0, %v170_v21  ;;  %v1511_v21 = vld [vmem:[#allocation10 + $0x1b0] ss:$12 sps:$4 sm:$0xff]   ;;  %v1550_v5 = vld [vmem:[#allocation10 + $0x168] ss:$12 sps:$4 sm:$0xff]   ;;  %vm1191_vm4 = vcmask 359424   ;;  %vm1289_vm5 = vcmask 7168  }
  0x75   :  { %554 = vmatprep.mubr.bf16.mxu1 %v1706_v1  ;;  %523 = vmatpush1.bf16.msra.mxu1 %v514_v59  ;;  %v1535_v59 = vld [vmem:[#allocation10 + $0x210] ss:$12 sps:$4 sm:$0xff]   ;;  %v1551_v6 = vld [vmem:[#allocation10 + $0xc8] ss:$12 sps:$4 sm:$0xff]  }
  0x76   :  { %1447 = vmatprep.subr.bf16.mxu1 %v1708_v2  ;;  %1015 = vmatpush1.bf16.msra.mxu0 %v1489_v12  ;;  %v1549_v3 = vld [vmem:[#allocation10 + $0x244] ss:$12 sps:$4 sm:$0xff]  }
  0x77   :  { %1016 = vmatprep.subr.bf16.mxu0 %v1490_v13 }
  0x7a   :  { %1017 = vmatpush1.bf16.msra.mxu0 %v1493_v15 }
  0x7b   :  { %1018 = vmatprep.subr.bf16.mxu0 %v1494_v11 }
  0x7c   :  { %1343 = vmatmul.mubr.msk.bf16.vlgmr.msra.gmra.mrb[8].mxu1 %vm508_vm2, %v499_v7 }
  0x7d   :  { %1448 = vmatpush3.bf16.msra.mxu1 %v520_v8  ;;  %1449 = vmatprep.mubr.msk.bf16.mxu1 %vm1709_vm3, %v1708_v2  ;;  %v1545_v2 = vld [vmem:[#allocation10 + $0x16c] ss:$12 sps:$4 sm:$0xff]  }
  0x7e   :  { %1047 = vmatprep.subr.bf16.mxu1 %v1501_v9  ;;  %1019 = vmatpush1.bf16.msra.mxu0 %v1496_v18  ;;  %v277_v18 = vld [vmem:[%s1994_s4] sm:$0xf] }
  0x7f   :  { %1020 = vmatprep.subr.bf16.mxu0 %v1497_v20  ;;  %v316_v20 = vrot.slane %v277_v18, %v1860_v23 }
  0x82   :  { %1021 = vmatpush1.bf16.msra.mxu0 %v1502_v24  ;;  %v312_v24 = vrot.slane %v277_v18, %v1858_v22 }
  0x84   :  { %1450 = vmatmul.mubr.msk.bf16.vlgmr.msra.gmra.mrb[12].mxu1 %vm508_vm2, %v499_v7 }
  0x85   :  { %1048 = vmatpush1.bf16.msra.mxu1 %v1499_v14 }
  0x86   :  { %1049 = vmatprep.subr.bf16.mxu1 %v1507_v16 }
  0x89   :  { %1050 = vmatpush1.bf16.msra.mxu1 %v1505_v17 }
  0x8a   :  { %1051 = vmatprep.subr.bf16.mxu1 %v1513_v19  ;;  %v278_v19 = vld [vmem:[#allocation8] sm:$0xf] }
  0x8d   :  { %1052 = vmatpush1.bf16.msra.mxu1 %v1511_v21  ;;  %v324_v21 = vrot.slane %v277_v18, %v1869_v31 }
 0x13f   :  { %v229_v25 = vpop.f32.mrb[0].mxu1 }
 0x140   :  { %v231_v28 = vpop.f32.mrb[1].mxu1  ;;  %v1871_v33 = vadd.f32 %v229_v25, %v126_v26  ;;  %v1503_v25 = vld [vmem:[#allocation10 + $0xc4] ss:$12 sps:$4 sm:$0xff]   ;;  %v1508_v26 = vld [vmem:[#allocation10 + $0xc0] ss:$12 sps:$4 sm:$0xff]  }
 0x141   :  { %v233_v30 = vpop.f32.mrb[2].mxu1  ;;  %v1873_v34 = vadd.f32 %v231_v28, %v130_v27  ;;  %1022 = vmatprep.subr.bf16.mxu0 %v1503_v25  ;;  %v1509_v27 = vld [vmem:[#allocation10 + $0xdc] ss:$12 sps:$4 sm:$0xff]   ;;  %v1514_v28 = vld [vmem:[#allocation10 + $0xd8] ss:$12 sps:$4 sm:$0xff]   ;;  %v320_v25 = vrot.slane %v277_v18, %v1867_v29 }
 0x142   :  { %v234_v32 = vpop.f32.mrb[3].mxu1  ;;  %1023 = vmatpush1.bf16.msra.mxu0 %v1508_v26 }
 0x143   :  { %v279_v38 = vadd.f32 %v1873_v34, %v1871_v33  ;;  %1024 = vmatprep.subr.bf16.mxu0 %v1509_v27  ;;  %v341_v27 = vrot.slane %v278_v19, %v1860_v23 }
 0x146   :  { %1025 = vmatpush1.bf16.msra.mxu0 %v1514_v28  ;;  %v349_v28 = vrot.slane %v278_v19, %v1869_v31 }
 0x147   :  { %v270_v37 = vpop.f32.mrb[4].mxu1 }
 0x148   :  { %v1879_v39 = vadd.f32 %v270_v37, %v134_v35  ;;  %v272_v40 = vpop.f32.mrb[5].mxu1 }
 0x149   :  { %v1881_v41 = vadd.f32 %v272_v40, %v138_v36  ;;  %v274_v42 = vpop.f32.mrb[6].mxu1 }
 0x14a   :  { %v275_v43 = vpop.f32.mrb[7].mxu1  ;;  %v280_v44 = vadd.f32 %v279_v38, %v1879_v39 }
 0x14b   :  { %v281_v45 = vsel %vm191_vm0, %v1881_v41, 0.0 }
 0x14c   :  { %v282_v46 = vadd.f32 %v281_v45, %v280_v44 }
 0x14e   :  { %283 = vadd.xlane.f32.xlu0 %v282_v46  ;;  %v1519_v46 = vld [vmem:[#allocation10 + $0x1cc] ss:$12 sps:$4 sm:$0xff]  }
 0x14f   :  { %1053 = vmatprep.subr.bf16.mxu1 %v1519_v46  ;;  %v1922_v7 = vpop.f32.mrb[8].mxu1 }
 0x150   :  { %1054 = vmatpush1.bf16.msra.mxu1 %v1517_v47  ;;  %v1924_v8 = vpop.f32.mrb[9].mxu1 }
 0x151   :  { %1055 = vmatprep.subr.bf16.mxu1 %v1525_v50  ;;  %v560_v9 = vpop.f32.mrb[10].mxu1 }
 0x152   :  { %v561_v10 = vpop.f32.mrb[11].mxu1  ;;  %v1570_v9 = vld [vmem:[#allocation10 + $0x98] ss:$12 sps:$4 sm:$0xff]  }
 0x153   :  { %v1571_v10 = vld [vmem:[#allocation10 + $0x218] ss:$12 sps:$4 sm:$0xff]  }
 0x154   :  { %1056 = vmatpush1.bf16.msra.mxu1 %v1523_v51 }
 0x155   :  { %1057 = vmatprep.subr.bf16.mxu1 %v1531_v54  ;;  %v1553_v54 = vld [vmem:[#allocation10 + $0x188] ss:$12 sps:$4 sm:$0xff]  }
 0x157   :  { %v1926_v12 = vpop.f32.mrb[12].mxu1 }
 0x158   :  { %1058 = vmatpush1.bf16.msra.mxu1 %v1529_v55  ;;  %v1451_v13 = vpop.f32.mrb[13].mxu1  ;;  %v1555_v55 = vld [vmem:[#allocation10 + $0x20] ss:$12 sps:$4 sm:$0xff]  }
 0x159   :  { %1059 = vmatprep.subr.bf16.mxu1 %v1537_v58  ;;  %v600_v14 = vpop.f32.mrb[14].mxu1  ;;  %v1558_v58 = vld [vmem:[#allocation10 + $0x38] ss:$12 sps:$4 sm:$0xff]   ;;  %v1572_v13 = vld [vmem:[#allocation10 + $0x170] ss:$12 sps:$4 sm:$0xff]  }
 0x15a   :  { %v1452_v15 = vpop.f32.mrb[15].mxu1  ;;  %v1573_v14 = vld [vmem:[#allocation10 + $0xb0] ss:$12 sps:$4 sm:$0xff]  }
 0x15b   :  { %v1574_v15 = vld [vmem:[#allocation10 + $0x230] ss:$12 sps:$4 sm:$0xff]  }
 0x15c   :  { %1060 = vmatpush1.bf16.msra.mxu1 %v1535_v59  ;;  %v1559_v59 = vld [vmem:[#allocation10 + $0x1b8] ss:$12 sps:$4 sm:$0xff]  }
 0x15d   :  { %1061 = vmatprep.subr.bf16.mxu1 %v1543_v62  ;;  %v1562_v62 = vld [vmem:[#allocation10 + $0x1d0] ss:$12 sps:$4 sm:$0xff]  }
 0x160   :  { %1062 = vmatpush1.bf16.msra.mxu1 %v1541_v63  ;;  %v1563_v63 = vld [vmem:[#allocation10 + $0x128] ss:$12 sps:$4 sm:$0xff]  }
 0x161   :  { %1063 = vmatprep.subr.bf16.mxu1 %v1549_v3  ;;  %v1566_v3 = vld [vmem:[#allocation10 + $0x140] ss:$12 sps:$4 sm:$0xff]  }
 0x164   :  { %1064 = vmatpush1.bf16.msra.mxu1 %v1547_v4  ;;  %v1567_v4 = vld [vmem:[#allocation10 + $0x80] ss:$12 sps:$4 sm:$0xff]  }
 0x165   :  { %1425 = vmatprep.subr.bf16.mxu1 %v1551_v6  ;;  %v1569_v6 = vld [vmem:[#allocation10 + $0x158] ss:$12 sps:$4 sm:$0xff]  }
 0x1db   :  { %v284_v30 = vpop.xlane.xlu0 %283 }
 0x1dc   :  { %v286_v32 = vmul.f32 0.0025, %v284_v30  ;;  %v337_v30 = vrot.slane %v278_v19, %v1858_v22 }
 0x1de   :  { %v1901_v35 = vsub.f32 %v1871_v33, %v286_v32  ;;  %v1904_v36 = vsub.f32 %v1873_v34, %v286_v32  ;;  %v1907_v37 = vsub.f32 %v1879_v39, %v286_v32  ;;  %v1910_v38 = vsub.f32 %v1881_v41, %v286_v32  ;;  %v1515_v41 = vld [vmem:[#allocation10 + $0xf4] ss:$12 sps:$4 sm:$0xff]  }
 0x1df   :  { %1026 = vmatprep.subr.bf16.mxu0 %v1515_v41  ;;  %v345_v32 = vrot.slane %v278_v19, %v1867_v29 }
 0x1e0   :  { %v291_v40 = vmul.f32 %v1901_v35, %v1901_v35  ;;  %v292_v42 = vmul.f32 %v1904_v36, %v1904_v36  ;;  %v294_v43 = vmul.f32 %v1910_v38, %v1910_v38  ;;  %v293_v33 = vmul.f32 %v1907_v37, %v1907_v37  ;;  %1027 = vmatpush1.bf16.msra.mxu0 %v1520_v48 }
 0x1e1   :  { %1028 = vmatprep.subr.bf16.mxu0 %v1521_v49 }
 0x1e2   :  { %v295_v34 = vadd.f32 %v292_v42, %v291_v40  ;;  %v297_v39 = vsel %vm191_vm0, %v294_v43, 0.0 }
 0x1e4   :  { %v296_v44 = vadd.f32 %v295_v34, %v293_v33  ;;  %1029 = vmatpush1.bf16.msra.mxu0 %v1526_v52 }
 0x1e5   :  { %1030 = vmatprep.subr.bf16.mxu0 %v1527_v53 }
 0x1e6   :  { %v298_v45 = vadd.f32 %v297_v39, %v296_v44 }
 0x1e8   :  { %299 = vadd.xlane.f32.xlu0 %v298_v45  ;;  %1031 = vmatpush1.bf16.msra.mxu0 %v1532_v56  ;;  %v1556_v56 = vld [vmem:[#allocation10 + $0x1a0] ss:$12 sps:$4 sm:$0xff]  }
 0x1e9   :  { %1032 = vmatprep.subr.bf16.mxu0 %v1533_v57  ;;  %v1557_v57 = vld [vmem:[#allocation10 + $0xf8] ss:$12 sps:$4 sm:$0xff]  }
 0x1ec   :  { %1033 = vmatpush1.bf16.msra.mxu0 %v1538_v60  ;;  %v1560_v60 = vld [vmem:[#allocation10 + $0x110] ss:$12 sps:$4 sm:$0xff]  }
 0x1ed   :  { %1034 = vmatprep.subr.bf16.mxu0 %v1539_v61  ;;  %v1561_v61 = vld [vmem:[#allocation10 + $0x50] ss:$12 sps:$4 sm:$0xff]  }
 0x1f0   :  { %1035 = vmatpush1.bf16.msra.mxu0 %v1544_v0  ;;  %v1564_v0 = vld [vmem:[#allocation10 + $0x68] ss:$12 sps:$4 sm:$0xff]  }
 0x1f1   :  { %1036 = vmatprep.subr.bf16.mxu0 %v1545_v2  ;;  %v1565_v2 = vld [vmem:[#allocation10 + $0x1e8] ss:$12 sps:$4 sm:$0xff]  }
 0x1f4   :  { %1037 = vmatpush1.bf16.msra.mxu0 %v1550_v5  ;;  %v1568_v5 = vld [vmem:[#allocation10 + $0x200] ss:$12 sps:$4 sm:$0xff]  }
 0x1f5   :  { %1128 = vmatprep.subr.bf16.mxu0 %v1706_v1 }
 0x275   :  { %v300_v16 = vpop.xlane.xlu0 %299 }
 0x276   :  { %v301_v11 = vmul.f32 0.0025, %v300_v16  ;;  %v1575_v16 = vld [vmem:[#allocation10 + $0x248] ss:$12 sps:$4 sm:$0xff]  }
 0x278   :  { %v302_v17 = vadd.f32 1e-05, %v301_v11 }
 0x27a   :  { %1576 = vrsqrt.f32 %v302_v17 }
 0x284   :  { %v1577_v26 = vpop.eup %1576 }
 0x285   :  { %v305_v40 = vmul.f32 %v1577_v26, %v1904_v36  ;;  %v307_v42 = vmul.f32 %v1577_v26, %v1910_v38  ;;  %v304_v43 = vmul.f32 %v1577_v26, %v1901_v35  ;;  %v306_v33 = vmul.f32 %v1577_v26, %v1907_v37  ;;  %v1552_v35 = vld [vmem:[#allocation10 + $0x8] ss:$12 sps:$4 sm:$0xff]   ;;  %v1554_v37 = vld [vmem:[#allocation10 + $0xe0] ss:$12 sps:$4 sm:$0xff]  }
 0x287   :  { %v330_v34 = vmul.f32 %v316_v20, %v305_v40  ;;  %v332_v44 = vmul.f32 %v324_v21, %v307_v42  ;;  %v329_v39 = vmul.f32 %v312_v24, %v304_v43  ;;  %v331_v45 = vmul.f32 %v320_v25, %v306_v33 }
 0x289   :  { %v355_v41 = vadd.f32 %v341_v27, %v330_v34  ;;  %v357_v46 = vadd.f32 %v349_v28, %v332_v44  ;;  %v354_v47 = vadd.f32 %v337_v30, %v329_v39  ;;  %v356_v31 = vadd.f32 %v345_v32, %v331_v45 }
 0x28b   :  { %v359_v48 = vmax.f32 %v355_v41, 0.0  ;;  %v361_v49 = vmax.f32 %v357_v46, 0.0  ;;  %v358_v50 = vmax.f32 %v354_v47, 0.0  ;;  %v360_v51 = vmax.f32 %v356_v31, 0.0 }
 0x28d   :  { %v363_v52 = vpack.c.bf16 %v359_v48, %v359_v48  ;;  %v365_v36 = vpack.c.bf16 %v361_v49, %v361_v49  ;;  %v362_v53 = vpack.c.bf16 %v358_v50, %v358_v50  ;;  %v1943_v38 = vpack.c.bf16 %v360_v51, %v360_v51 }
 0x28f   :  { %1038 = vmatprep.mubr.bf16.mxu0 %v363_v52  ;;  %1420 = vmatprep.mubr.msk.bf16.mxu1 %vm191_vm0, %v365_v36 }
 0x290   :  { %1039 = vmatmul.mubr.bf16.vlgmr.msra.gmra.mrb[0].mxu0 %v362_v53  ;;  %1080 = vmatmul.mubr.bf16.vlgmr.msra.gmra.mrb[16].mxu1 %v1943_v38 }
 0x291   :  { %1426 = vmatpush3.bf16.msra.mxu1 %v1552_v35  ;;  %1129 = vmatpush1.bf16.msra.mxu0 %v1553_v54 }
 0x292   :  { %1120 = vmatprep.mubr.bf16.mxu1 %v363_v52  ;;  %1421 = vmatprep.mubr.msk.bf16.mxu0 %vm191_vm0, %v365_v36 }
 0x293   :  { %1427 = vmatprep.subr.bf16.mxu1 %v1554_v37  ;;  %1130 = vmatprep.subr.bf16.mxu0 %v1706_v1 }
 0x295   :  { %1428 = vmatpush3.bf16.msra.mxu1 %v1555_v55  ;;  %1131 = vmatpush1.bf16.msra.mxu0 %v1556_v56 }
 0x296   :  { %1429 = vmatprep.subr.bf16.mxu1 %v1557_v57  ;;  %1132 = vmatprep.subr.bf16.mxu0 %v1706_v1 }
 0x299   :  { %1430 = vmatpush3.bf16.msra.mxu1 %v1558_v58  ;;  %1133 = vmatpush1.bf16.msra.mxu0 %v1559_v59 }
 0x29a   :  { %1431 = vmatprep.subr.bf16.mxu1 %v1560_v60  ;;  %1134 = vmatprep.subr.bf16.mxu0 %v1706_v1 }
 0x29d   :  { %1432 = vmatpush3.bf16.msra.mxu1 %v1561_v61  ;;  %1135 = vmatpush1.bf16.msra.mxu0 %v1562_v62  ;;  %v1188_v62 = vld [vmem:[%s1999_s9] sm:$0x7] }
 0x29e   :  { %1433 = vmatprep.subr.bf16.mxu1 %v1563_v63  ;;  %1136 = vmatprep.subr.bf16.mxu0 %v1706_v1  ;;  %v1189_v63 = vld [vmem:[%s2000_s10] sm:$0x7] }
 0x2a1   :  { %1434 = vmatpush3.bf16.msra.mxu1 %v1564_v0  ;;  %1137 = vmatpush1.bf16.msra.mxu0 %v1565_v2  ;;  %v1219_v0 = vrot.slane %v1188_v62, %v1858_v22  ;;  %v1223_v2 = vrot.slane %v1188_v62, %v1860_v23 }
 0x2a2   :  { %1435 = vmatprep.subr.bf16.mxu1 %v1566_v3  ;;  %1138 = vmatprep.subr.bf16.mxu0 %v1706_v1  ;;  %v1227_v3 = vrot.slane %v1188_v62, %v1867_v29 }
 0x2a5   :  { %1436 = vmatpush3.bf16.msra.mxu1 %v1567_v4  ;;  %1139 = vmatpush1.bf16.msra.mxu0 %v1568_v5  ;;  %v1238_v5 = vrot.slane %v1189_v63, %v1858_v22 }
 0x2a6   :  { %1437 = vmatprep.subr.bf16.mxu1 %v1569_v6  ;;  %1140 = vmatprep.subr.bf16.mxu0 %v1706_v1  ;;  %v1242_v6 = vrot.slane %v1189_v63, %v1860_v23 }
 0x2a9   :  { %1438 = vmatpush3.bf16.msra.mxu1 %v1570_v9  ;;  %1141 = vmatpush1.bf16.msra.mxu0 %v1571_v10 }
 0x2aa   :  { %1439 = vmatprep.subr.bf16.mxu1 %v1572_v13  ;;  %1142 = vmatprep.subr.bf16.mxu0 %v1706_v1 }
 0x2ad   :  { %1440 = vmatpush3.bf16.msra.mxu1 %v1573_v14  ;;  %1143 = vmatpush1.bf16.msra.mxu0 %v1574_v15  ;;  %v1246_v14 = vrot.slane %v1189_v63, %v1867_v29  ;;  %v1256_v15 = vld [vmem:[%s2001_s11] sm:$0x7] }
 0x2ae   :  { %1144 = vmatprep.subr.bf16.mxu0 %v1706_v1  ;;  %v1168_v1 = vld [vmem:[%s1998_s8] sm:$0x7] }
 0x2af   :  { %v1173_v40 = vrot.slane %v1168_v1, %v1858_v22  ;;  %v1177_v42 = vrot.slane %v1168_v1, %v1860_v23  ;;  %v1181_v39 = vrot.slane %v1168_v1, %v1867_v29 }
 0x2b0   :  { %1121 = vmatmul.mubr.bf16.vlgmr.msra.gmra.mrb[20].mxu1 %v362_v53 }
 0x2b1   :  { %1145 = vmatpush1.bf16.msra.mxu0 %v1575_v16 }
 0x2b4   :  { %1161 = vmatmul.mubr.bf16.vlgmr.msra.gmra.mrb[4].mxu0 %v1943_v38 }
 0x363   :  { %v1040_v11 = vpop.f32.mrb[0].mxu0  ;;  %v1081_v17 = vpop.f32.mrb[16].mxu1 }
 0x364   :  { %v1041_v18 = vadd.f32 %v1040_v11, %v1922_v7  ;;  %v1042_v19 = vpop.f32.mrb[1].mxu0  ;;  %v1083_v20 = vpop.f32.mrb[17].mxu1 }
 0x365   :  { %v1043_v21 = vadd.f32 %v1042_v19, %v1924_v8  ;;  %v1044_v24 = vpop.f32.mrb[2].mxu0  ;;  %v1085_v25 = vpop.f32.mrb[18].mxu1  ;;  %v1265_v19 = vrot.slane %v1256_v15, %v1860_v23 }
 0x366   :  { %v1082_v26 = vadd.f32 %v1081_v17, %v1041_v18  ;;  %v1045_v27 = vpop.f32.mrb[3].mxu0  ;;  %v1086_v28 = vpop.f32.mrb[19].mxu1  ;;  %v1261_v18 = vrot.slane %v1256_v15, %v1858_v22  ;;  %v1269_v25 = vrot.slane %v1256_v15, %v1867_v29 }
 0x367   :  { %v1084_v30 = vadd.f32 %v1083_v20, %v1043_v21 }
 0x368   :  { %v1185_v45 = vadd.f32 %v1173_v40, %v1082_v26 }
 0x369   :  { %v1186_v41 = vadd.f32 %v1177_v42, %v1084_v30 }
 0x36b   :  { %v1190_v50 = vadd.f32 %v1186_v41, %v1185_v45 }
 0x383   :  { %v1441_v32 = vpop.f32.mrb[20].mxu1 }
 0x384   :  { %v1442_v7 = vpop.f32.mrb[21].mxu1 }
 0x385   :  { %v1443_v43 = vadd.f32 %v1442_v7, %v1441_v32  ;;  %v1444_v33 = vpop.f32.mrb[22].mxu1 }
 0x386   :  { %v1445_v34 = vpop.f32.mrb[23].mxu1 }
 0x387   :  { %v1123_v8 = vadd.f32 %v1443_v43, %v1926_v12  ;;  %v1162_v44 = vpop.f32.mrb[4].mxu0  ;;  %v1422_v43 = vld [vmem:[#allocation2] ss:$0 sm:$0xff] }
 0x388   :  { %v1164_v46 = vpop.f32.mrb[5].mxu0 }
 0x389   :  { %v1163_v47 = vadd.f32 %v1162_v44, %v1123_v8  ;;  %v1165_v31 = vpop.f32.mrb[6].mxu0 }
 0x38a   :  { %v1166_v48 = vpop.f32.mrb[7].mxu0 }
 0x38b   :  { %v1187_v49 = vadd.f32 %v1181_v39, %v1163_v47 }
 0x38d   :  { %v1192_v51 = vsel %vm1191_vm4, %v1187_v49, 0.0 }
 0x38e   :  { %v1193_v52 = vadd.f32 %v1192_v51, %v1190_v50 }
 0x390   :  { %1194 = vadd.xlane.f32.xlu1 %v1193_v52 }
 0x41d   :  { %v1195_v36 = vpop.xlane.xlu1 %1194 }
 0x41e   :  { %v1197_v53 = vmul.f32 0.0033333334, %v1195_v36 }
 0x420   :  { %v1198_v38 = vsub.f32 %v1185_v45, %v1197_v53  ;;  %v1199_v12 = vsub.f32 %v1186_v41, %v1197_v53  ;;  %v1200_v35 = vsub.f32 %v1187_v49, %v1197_v53 }
 0x422   :  { %v1201_v54 = vmul.f32 %v1198_v38, %v1198_v38  ;;  %v1202_v37 = vmul.f32 %v1199_v12, %v1199_v12  ;;  %v1203_v55 = vmul.f32 %v1200_v35, %v1200_v35 }
 0x424   :  { %v1204_v56 = vadd.f32 %v1202_v37, %v1201_v54  ;;  %v1205_v57 = vsel %vm1191_vm4, %v1203_v55, 0.0 }
 0x426   :  { %v1206_v58 = vadd.f32 %v1205_v57, %v1204_v56 }
 0x428   :  { %1207 = vadd.xlane.f32.xlu1 %v1206_v58 }
 0x4b5   :  { %v1208_v59 = vpop.xlane.xlu1 %1207 }
 0x4b6   :  { %v1209_v60 = vmul.f32 0.0033333334, %v1208_v59 }
 0x4b8   :  { %v1210_v61 = vadd.f32 1e-05, %v1209_v60 }
 0x4ba   :  { %1578 = vrsqrt.f32 %v1210_v61 }
 0x4c4   :  { %v1579_v4 = vpop.eup %1578 }
 0x4c5   :  { %v1212_v9 = vmul.f32 %v1579_v4, %v1198_v38  ;;  %v1213_v10 = vmul.f32 %v1579_v4, %v1199_v12  ;;  %v1214_v13 = vmul.f32 %v1579_v4, %v1200_v35 }
 0x4c7   :  { %v1231_v16 = vmul.f32 %v1219_v0, %v1212_v9  ;;  %v1232_v11 = vmul.f32 %v1223_v2, %v1213_v10  ;;  %v1233_v17 = vmul.f32 %v1227_v3, %v1214_v13 }
 0x4c9   :  { %v1250_v20 = vadd.f32 %v1238_v5, %v1231_v16  ;;  %v1251_v21 = vadd.f32 %v1242_v6, %v1232_v11  ;;  %v1252_v24 = vadd.f32 %v1246_v14, %v1233_v17 }
 0x4cb   :  { %v1253_v26 = vmax.f32 %v1250_v20, 0.0  ;;  %v1254_v27 = vmax.f32 %v1251_v21, 0.0  ;;  %v1255_v28 = vmax.f32 %v1252_v24, 0.0 }
 0x4cd   :  { %v1273_v30 = vmul.f32 %v1261_v18, %v1253_v26  ;;  %v1274_v1 = vmul.f32 %v1265_v19, %v1254_v27  ;;  %v1275_v32 = vmul.f32 %v1269_v25, %v1255_v28 }
 0x4cf   :  { %v1276_v40 = vadd.f32 %v1274_v1, %v1273_v30  ;;  %v1277_v42 = vsel %vm1191_vm4, %v1275_v32, 0.0 }
 0x4d1   :  { %v1278_v7 = vadd.f32 %v1277_v42, %v1276_v40 }
 0x4d3   :  { %1279 = vadd.xlane.f32.xlu0 %v1278_v7 }
 0x560   :  { %v1280_v22 = vpop.xlane.xlu0 %1279 }
 0x561   :  { %v1288_v23 = vadd.f32 %v1422_v43, %v1280_v22 }
 0x563   :  { %1290 = vst.msk [vmem:[#allocation11] sm:$0xff] %vm1289_vm5, %v1288_v23 }
 0x56a   :  { %v1308_v33 = vld [vmem:[#allocation11] sm:$0x3] }
 0x56b   :  { %1309 = vst [vmem:[%s2003_s13] sm:$0x3] %v1308_v33 }
 0x56c   :  { %1326 = vsyncpa [#allocation4], 1 }
 0x56d   :  { %1327 = vsyncpa [#allocation6], 1 }
 0x56e   :  { %1328 = vsyncpa [#allocation9], 1 }

</bundles_post_ra>
